<compile_context>
chip_gen: v7x
topology: tpu7x:2x2x1
jax: 0.10.0
libtpu: 0.0.40
codegen_flags: <defaults>
</compile_context>

<pallas_src>
from typing import NamedTuple, Tuple

import jax
import jax.numpy as jnp
from jax.experimental import pallas as pl
from jax.experimental.pallas import tpu as pltpu

_LANE = 128      # vreg lane width (last dim)
_SUBLANE = 8     # vreg sublane width (second-to-last dim)


def _round_up(x: int, m: int) -> int:
    return (x + m - 1) // m * m


def _cdiv(a: int, b: int) -> int:
    return -(-a // b)


class MLPLayout(NamedTuple):
    """Static (python-int) description of the packed weight slab."""
    ob_dim: int
    ac_dim: int
    layer_rows: Tuple[int, ...]   # padded contraction rows per weight block
    layer_cols: Tuple[int, ...]   # padded output width per layer (last = ac_pad)
    bias_row0: int                # first row of the shared bias block
    slab_shape: Tuple[int, int]


def pack_mlp_params(params):
    """Pack [W0,b0,...,Wn,bn] into ONE lane-dense f32 slab + static layout.

    Call once whenever the parameters change (NOT per forward).  Zero padding is
    semantics-preserving: padded obs lanes are 0, padded weight rows/cols are 0,
    padded bias lanes are 0, and tanh(0)=0, so padded columns never contaminate
    real columns.
    """
    assert len(params) % 2 == 0 and len(params) >= 2
    n_lin = len(params) // 2
    ws = [jnp.asarray(params[2 * k], jnp.float32) for k in range(n_lin)]
    bs = [jnp.asarray(params[2 * k + 1], jnp.float32).reshape(-1) for k in range(n_lin)]
    ins = [int(w.shape[0]) for w in ws]
    outs = [int(w.shape[1]) for w in ws]
    ob_dim, ac_dim = ins[0], outs[-1]

    # Padded output widths (hidden activations lane-dense; last layer contracts
    # straight into the ac-padded output width -> small output writeback).
    layer_cols = tuple(_round_up(o, _LANE) for o in outs)
    # Padded contraction rows: layer 0 consumes the 8-aligned obs width, layer
    # k>0 consumes the previous layer's padded activation width.
    layer_rows = tuple(_round_up(ob_dim, _SUBLANE) if k == 0 else layer_cols[k - 1]
                       for k in range(n_lin))
    slab_w = max(layer_cols)
    bias_row0 = sum(layer_rows)
    bias_rows = _round_up(n_lin, _SUBLANE)

    blocks = [jnp.pad(w, ((0, layer_rows[k] - ins[k]), (0, slab_w - outs[k])))
              for k, w in enumerate(ws)]
    bias_blk = jnp.stack([jnp.pad(b, (0, slab_w - outs[k])) for k, b in enumerate(bs)])
    bias_blk = jnp.pad(bias_blk, ((0, bias_rows - n_lin), (0, 0)))
    slab = jnp.concatenate(blocks + [bias_blk], axis=0)

    layout = MLPLayout(ob_dim, ac_dim, layer_rows, layer_cols, bias_row0,
                       (bias_row0 + bias_rows, slab_w))
    assert slab.shape == layout.slab_shape
    return slab, layout


def _make_mlp_kernel(layer_rows, layer_cols, bias_row0, bf16_matmul):
    """Whole MLP on one (tile_b, ob_pad) batch tile; weights in one packed slab."""
    n_lin = len(layer_rows)

    def kernel(obs_ref, slab_ref, out_ref):
        h = obs_ref[...]                                         # (tile_b, ob_pad) f32
        row = 0
        for k in range(n_lin):                                   # statically unrolled
            rows, cols = layer_rows[k], layer_cols[k]
            w = slab_ref[row:row + rows, :cols]                  # static slice
            b = slab_ref[bias_row0 + k:bias_row0 + k + 1, :cols]
            if bf16_matmul:
                acc = jnp.dot(h.astype(jnp.bfloat16), w.astype(jnp.bfloat16),
                              preferred_element_type=jnp.float32)
            else:
                acc = jnp.dot(h, w, preferred_element_type=jnp.float32)
            h = acc + b                                          # bias + tanh stay f32
            if k < n_lin - 1:
                h = jnp.tanh(h)
            row += rows
        out_ref[...] = h.astype(out_ref.dtype)                   # (tile_b, ac_pad)

    return kernel


def mlp_policy_forward(obs, slab, layout: MLPLayout, logstd=None, *,
                       use_bf16_matmul=False, max_tile_b=256):
    """MLPPolicy forward in a single Pallas kernel.

    obs:    (batch, ob_dim) float
    slab:   packed weight slab from pack_mlp_params (pack once, reuse every step)
    layout: static layout from pack_mlp_params
    logstd: (ac_dim,) / (1, ac_dim) float or None.  None => discrete -> logits.
            Otherwise returns (mean, std) with std = exp(logstd).
    """
    obs = jnp.asarray(obs, jnp.float32)
    assert obs.ndim == 2 and obs.shape[1] == layout.ob_dim
    batch = obs.shape[0]
    ob_pad = layout.layer_rows[0]
    ac_pad = layout.layer_cols[-1]
    n_lin = len(layout.layer_rows)

    # Batch tiling: minimal remainder padding; tiles capped at 256 rows so large
    # batches always yield >= 2 "parallel" grid steps (v7x: 2 TensorCores).
    n_tiles = max(1, _cdiv(batch, max_tile_b))
    tile_b = _round_up(_cdiv(batch, n_tiles), _SUBLANE)
    b_pad = n_tiles * tile_b

    # Batch-pad only (no lane-padding round trip through HBM).
    obs_p = jnp.pad(obs, ((0, b_pad - batch), (0, ob_pad - layout.ob_dim)))

    kernel = _make_mlp_kernel(layout.layer_rows, layout.layer_cols,
                              layout.bias_row0, use_bf16_matmul)

    # VMEM budget: double-buffered I/O tiles + slab + a few activation tiles.
    act_w = max(layout.layer_cols)
    slab_bytes = 4 * layout.slab_shape[0] * layout.slab_shape[1]
    vmem_est = (2 * 4 * tile_b * (ob_pad + ac_pad) + 2 * slab_bytes
                + 6 * 4 * tile_b * act_w)
    vmem_limit = int(min(max(2 * vmem_est, 32 * 1024 * 1024), 48 * 1024 * 1024))

    cost = pl.CostEstimate(
        flops=2 * b_pad * sum(r * c for r, c in zip(layout.layer_rows, layout.layer_cols)),
        transcendentals=b_pad * act_w * (n_lin - 1),
        bytes_accessed=4 * (obs_p.size + layout.slab_shape[0] * layout.slab_shape[1]
                            + b_pad * ac_pad),
    )

    out_pad = pl.pallas_call(
        kernel,
        out_shape=jax.ShapeDtypeStruct((b_pad, ac_pad), jnp.float32),
        grid_spec=pltpu.PrefetchScalarGridSpec(
            num_scalar_prefetch=0,
            grid=(n_tiles,),
            in_specs=[
                pl.BlockSpec((tile_b, ob_pad), lambda i: (i, 0)),      # batch tile
                pl.BlockSpec(layout.slab_shape, lambda i: (0, 0)),     # grid-invariant weights
            ],
            out_specs=pl.BlockSpec((tile_b, ac_pad), lambda i: (i, 0)),  # ac-width, lane-dense
        ),
        compiler_params=pltpu.CompilerParams(
            dimension_semantics=("parallel",),
            vmem_limit_bytes=vmem_limit,
        ),
        cost_estimate=cost,
    )(obs_p, slab)

    head = out_pad[:batch, :layout.ac_dim]
    if logstd is None:
        return head                                                   # Categorical logits
    std = jnp.exp(jnp.asarray(logstd, jnp.float32).reshape(1, layout.ac_dim))
    return head, std                                                  # Normal mean, std


def init_mlp_params(key, ob_dim, ac_dim, n_layers, layer_size):
    """Deterministic init mimicking nn.Linear defaults (U[-1/sqrt(fan_in), +])."""
    sizes = [ob_dim] + [layer_size] * n_layers + [ac_dim]
    params = []
    for fan_in, fan_out in zip(sizes[:-1], sizes[1:]):
        key, kw, kb = jax.random.split(key, 3)
        bound = 1.0 / jnp.sqrt(jnp.float32(fan_in))
        w = jax.random.uniform(kw, (fan_in, fan_out), jnp.float32, -bound, bound)
        b = jax.random.uniform(kb, (fan_out,), jnp.float32, -bound, bound)
        params += [w, b]
    return params


def _reference_forward(obs, params, logstd=None):
    """Pure-JAX reference of the same MLP for correctness checking."""
    n_layers = len(params) // 2 - 1
    h = obs
    for layer in range(n_layers + 1):
        h = h @ params[2 * layer] + params[2 * layer + 1].reshape(1, -1)
        if layer < n_layers:
            h = jnp.tanh(h)
    if logstd is None:
        return h
    return h, jnp.exp(jnp.asarray(logstd).reshape(1, -1))


if __name__ == "__main__":
    # Small shapes consistent with the module's forward().
    batch, ob_dim, ac_dim = 2, 16, 4
    n_layers, layer_size = 2, 32

    key = jax.random.PRNGKey(0)
    key, k_obs = jax.random.split(key)
    obs = jax.random.normal(k_obs, (batch, ob_dim), jnp.float32)

    # --- continuous policy (mean_net + logstd): pack ONCE, then forward ---
    params_c = init_mlp_params(jax.random.PRNGKey(1), ob_dim, ac_dim, n_layers, layer_size)
    logstd = jnp.zeros((ac_dim,), jnp.float32)   # nn.Parameter(torch.zeros(ac_dim))
    slab_c, layout_c = pack_mlp_params(params_c)

    mean, std = mlp_policy_forward(obs, slab_c, layout_c, logstd)
    mean = jax.block_until_ready(mean)
    std = jax.block_until_ready(std)
    ref_mean, ref_std = _reference_forward(obs, params_c, logstd)
    assert jnp.allclose(mean, ref_mean, atol=1e-5, rtol=1e-5)
    assert jnp.allclose(std, ref_std, atol=1e-5, rtol=1e-5)

    # --- discrete policy (logits_net): pack ONCE, reuse slab across batches ---
    params_d = init_mlp_params(jax.random.PRNGKey(2), ob_dim, ac_dim, n_layers, layer_size)
    slab_d, layout_d = pack_mlp_params(params_d)

    logits = jax.block_until_ready(mlp_policy_forward(obs, slab_d, layout_d))
    assert jnp.allclose(logits, _reference_forward(obs, params_d), atol=1e-5, rtol=1e-5)

    # Larger batch exercises the multi-tile parallel grid (600 -> 3 x 200 rows,
    # no 1024-row over-padding) while reusing the already-packed slab.
    key, k_big = jax.random.split(key)
    obs_big = jax.random.normal(k_big, (600, ob_dim), jnp.float32)
    logits_big = jax.block_until_ready(mlp_policy_forward(obs_big, slab_d, layout_d))
    assert jnp.allclose(logits_big, _reference_forward(obs_big, params_d),
                        atol=1e-5, rtol=1e-5)

    # Optional bf16-operand matmul path (f32 accumulate) — looser tolerance.
    logits_bf16 = jax.block_until_ready(
        mlp_policy_forward(obs_big, slab_d, layout_d, use_bf16_matmul=True))
    assert jnp.allclose(logits_bf16, _reference_forward(obs_big, params_d),
                        atol=5e-2, rtol=5e-2)

    print("KERNEL_OK")
</pallas_src>

<mosaic_0001>
module attributes {stable_mosaic.version = 11 : i64} {
  func.func @kernel(%arg0: i32, %arg1: memref<8x16xf32, #tpu.memory_space<vmem>>, %arg2: memref<280x128xf32, #tpu.memory_space<vmem>>, %arg3: memref<8x128xf32, #tpu.memory_space<vmem>>) attributes {dimension_semantics = [#tpu.dimension_semantics<parallel>], iteration_bounds = array<i64: 1>, scalar_prefetch = 0 : i64, scratch_operands = 0 : i64, tpu.core_type = #tpu.core_type<tc>, window_params = [{transform_indices = @transform_0, window_bounds = array<i64: 8, 16>}, {pipeline_mode = #tpu.pipeline_mode<synchronous>, transform_indices = @transform_1, window_bounds = array<i64: 280, 128>}, {transform_indices = @transform_2, window_bounds = array<i64: 8, 128>}]} {
    %c0 = arith.constant 0 : index
    %c0_0 = arith.constant 0 : index
    %0 = vector.load %arg1[%c0, %c0_0] : memref<8x16xf32, #tpu.memory_space<vmem>>, vector<8x16xf32>
    %c0_1 = arith.constant 0 : index
    %c0_2 = arith.constant 0 : index
    %1 = vector.load %arg2[%c0_1, %c0_2] : memref<280x128xf32, #tpu.memory_space<vmem>>, vector<16x128xf32>
    %c272 = arith.constant 272 : index
    %c0_3 = arith.constant 0 : index
    %2 = vector.load %arg2[%c272, %c0_3] : memref<280x128xf32, #tpu.memory_space<vmem>>, vector<1x128xf32>
    %cst = arith.constant dense<0.000000e+00> : vector<8x128xf32>
    %3 = tpu.matmul %0, %1, %cst {dimension_numbers = #tpu.dot_dimension_numbers<[1], [0], [0], [1], [0, 0, 1, 1], [], []>} : vector<8x16xf32>, vector<16x128xf32>, vector<8x128xf32> -> vector<8x128xf32>
    %4 = vector.broadcast %2 : vector<1x128xf32> to vector<8x128xf32>
    %5 = arith.addf %3, %4 : vector<8x128xf32>
    %6 = math.tanh %5 : vector<8x128xf32>
    %c16 = arith.constant 16 : index
    %c0_4 = arith.constant 0 : index
    %7 = vector.load %arg2[%c16, %c0_4] : memref<280x128xf32, #tpu.memory_space<vmem>>, vector<128x128xf32>
    %c273 = arith.constant 273 : index
    %c0_5 = arith.constant 0 : index
    %8 = vector.load %arg2[%c273, %c0_5] : memref<280x128xf32, #tpu.memory_space<vmem>>, vector<1x128xf32>
    %cst_6 = arith.constant dense<0.000000e+00> : vector<8x128xf32>
    %9 = tpu.matmul %6, %7, %cst_6 {dimension_numbers = #tpu.dot_dimension_numbers<[1], [0], [0], [1], [0, 0, 1, 1], [], []>} : vector<8x128xf32>, vector<128x128xf32>, vector<8x128xf32> -> vector<8x128xf32>
    %10 = vector.broadcast %8 : vector<1x128xf32> to vector<8x128xf32>
    %11 = arith.addf %9, %10 : vector<8x128xf32>
    %12 = math.tanh %11 : vector<8x128xf32>
    %c144 = arith.constant 144 : index
    %c0_7 = arith.constant 0 : index
    %13 = vector.load %arg2[%c144, %c0_7] : memref<280x128xf32, #tpu.memory_space<vmem>>, vector<128x128xf32>
    %c274 = arith.constant 274 : index
    %c0_8 = arith.constant 0 : index
    %14 = vector.load %arg2[%c274, %c0_8] : memref<280x128xf32, #tpu.memory_space<vmem>>, vector<1x128xf32>
    %cst_9 = arith.constant dense<0.000000e+00> : vector<8x128xf32>
    %15 = tpu.matmul %12, %13, %cst_9 {dimension_numbers = #tpu.dot_dimension_numbers<[1], [0], [0], [1], [0, 0, 1, 1], [], []>} : vector<8x128xf32>, vector<128x128xf32>, vector<8x128xf32> -> vector<8x128xf32>
    %16 = vector.broadcast %14 : vector<1x128xf32> to vector<8x128xf32>
    %17 = arith.addf %15, %16 : vector<8x128xf32>
    %c0_10 = arith.constant 0 : index
    %c0_11 = arith.constant 0 : index
    %18 = vector.load %arg3[%c0_10, %c0_11] : memref<8x128xf32, #tpu.memory_space<vmem>>, vector<8x128xf32>
    tpu.vector_store %arg3[%c0_10, %c0_11], %17 {strides = array<i32>} : memref<8x128xf32, #tpu.memory_space<vmem>>, vector<8x128xf32>,
    return
  }
  func.func @transform_0(%arg0: i32) -> (i32, i32) {
    %c0_i32 = arith.constant 0 : i32
    %c0_i32_0 = arith.constant 0 : i32
    return %arg0, %c0_i32 : i32, i32
  }
  func.func @transform_1(%arg0: i32) -> (i32, i32) {
    %c0_i32 = arith.constant 0 : i32
    %c0_i32_0 = arith.constant 0 : i32
    %c0_i32_1 = arith.constant 0 : i32
    return %c0_i32, %c0_i32_0 : i32, i32
  }
  func.func @transform_2(%arg0: i32) -> (i32, i32) {
    %c0_i32 = arith.constant 0 : i32
    %c0_i32_0 = arith.constant 0 : i32
    return %arg0, %c0_i32 : i32, i32
  }
}

</mosaic_0001>

<bundles_post_ra>
// kernel: tpu_custom_call.1
= control target key start
LH: loop header
LB: loop body
LE: loop exit
PB: predicated region body
PF: predicated region fallthrough
CT: control target
= control target key end

     0   :  { %7 = vsyncpa [#allocation3], 0  ;;  %s660_s0 = inlined_call_operand.hbm [shape: f32[8,16], index: 0, kind: input, shape index: {}]   ;;  %s661_s1 = inlined_call_operand.hbm [shape: f32[280,128], index: 1, kind: input, shape index: {}]   ;;  %s662_s2 = inlined_call_operand.hbm [shape: f32[8,128], index: 2, kind: output, shape index: {}]  }
   0x1   :  { %8 = vsyncpa [#allocation6], 0 }
   0x2   :  { %9 = vsyncpa [#allocation4], 0  ;;  %s574_s9 = smov [#allocation2]   ;;  %s575_s11 = smov [#allocation5]  }
   0x3   :  { %s16_s10 = sshll.u32 %s574_s9, 4  ;;  %s25_s12 = sshll.u32 %s575_s11, 4  ;;  %s17_s10 = int_to_ptr.vmem [resolvable:$true] %s16_s10  ;;  %s597_s12 = int_to_ptr.vmem [resolvable:$true] %s25_s12 }
   0x4   :  { %s502_s15 = scalar_lea.hbm %s660_s0, 128 }
   0x5   :  { %p503_p0 = scmp.ne.s32.totalorder %s660_s0, %s502_s15  ;;  %p506_p1 = scmp.lt.u32.totalorder %s502_s15, %s660_s0 }
   0x7   :  { %p508_p2 = pnand %p506_p1, %p503_p0 }
   0x9   :  { %511 = shalt.err (!%p508_p2)
}
   0xa   :  { %s512_s20 = scalar_lea.vmem %s17_s10, 128  ;;  %p517_p4 = scmp.lt.s32.totalorder %s17_s10, %s17_s10 }
   0xb   :  { %p513_p3 = scmp.ne.s32.totalorder %s17_s10, %s512_s20  ;;  %p518_p5 = scmp.lt.s32.totalorder %s512_s20, %s512_s20 }
   0xd   :  { %p519_p6 = por %p518_p5, %p517_p4 }
   0xf   :  { %p520_p7 = pnand %p519_p6, %p513_p3 }
  0x11   :  { %523 = shalt.err (!%p520_p7)
}
  0x12   :  { %19 = dma.hbm_to_vmem [thread:$0]  %s660_s0, 128, %s17_s10, [#allocation3]  }
  0x13   :  { %s524_s25 = scalar_lea.hbm %s661_s1, 4480 }
  0x14   :  { %p525_p8 = scmp.ne.s32.totalorder %s661_s1, %s524_s25  ;;  %p528_p9 = scmp.lt.u32.totalorder %s524_s25, %s661_s1 }
  0x16   :  { %p530_p10 = pnand %p528_p9, %p525_p8 }
  0x18   :  { %533 = shalt.err (!%p530_p10)
}
  0x19   :  { %s534_s30 = scalar_lea.vmem %s597_s12, 4480  ;;  %p539_p12 = scmp.lt.s32.totalorder %s597_s12, %s597_s12 }
  0x1a   :  { %p535_p11 = scmp.ne.s32.totalorder %s597_s12, %s534_s30  ;;  %p540_p13 = scmp.lt.s32.totalorder %s534_s30, %s534_s30 }
  0x1c   :  { %p541_p0 = por %p540_p13, %p539_p12 }
  0x1e   :  { %p542_p1 = pnand %p541_p0, %p535_p11 }
  0x20   :  { %545 = shalt.err (!%p542_p1)
}
  0x21   :  { %s576_s0 = smov 128   ;;  %s577_s3 = smov 8  }
  0x22   :  { %31 = dma.hbm_to_vmem [thread:$0]  %s661_s1, 4480, %s597_s12, [#allocation6], %s576_s0, %s576_s0, %s577_s3  }
  0x23   :  { %568 = dma.done.wait [#allocation3], 128  }
  0x24   :  { %569 = vsyncadd [#allocation3], 4294967168 }
  0x25   :  { %570 = dma.done.wait [#allocation6], 4480  }
  0x26   :  { %571 = vsyncadd [#allocation6], 4294962816  ;;  %v578_v0 = vmov 0.0|0.0   ;;  %vm579_vm0 = vmmov 0   ;;  %v580_v1 = vmov 0.0   ;;  %v39_v2 = vld [vmem:[#allocation5] sm:$0xff] }
  0x27   :  { %439 = vmatprep.subr.bf16.mxu0 %v578_v0  ;;  %366 = vmatprep.mubr.msk.f32.mxu0 %vm579_vm0, %v580_v1  ;;  %v40_v3 = vld [vmem:[#allocation5 + $0x8] sm:$0xff]  ;;  %v121_v5 = vld [vmem:[#allocation5 + $0x10] sm:$0xff]  ;;  %v122_v6 = vld [vmem:[#allocation5 + $0x18] sm:$0xff]  ;;  %vm46_vm1 = vcmask 130048   ;;  %s581_s1 = smov [#allocation7]  }
  0x28   :  { %442 = vmatprep.subr.bf16.mxu1 %v578_v0  ;;  %401 = vmatprep.mubr.msk.f32.mxu1 %vm579_vm0, %v580_v1  ;;  %v440_v4 = vpack.c.bf16 %v40_v3, %v39_v2  ;;  %v123_v7 = vld [vmem:[#allocation5 + $0x20] sm:$0xff]  ;;  %v443_v8 = vpack.c.bf16 %v122_v6, %v121_v5  ;;  %v124_v9 = vld [vmem:[#allocation5 + $0x28] sm:$0xff]  ;;  %v38_v10 = vld [vmem:[#allocation2] sm:$0xff]  ;;  %s311_s6 = sshll.u32 %s581_s1, 4  ;;  %s312_s6 = int_to_ptr.vmem [resolvable:$true] %s311_s6 }
  0x29   :  { %v446_v11 = vpack.c.bf16 %v124_v9, %v123_v7  ;;  %v125_v12 = vld [vmem:[#allocation5 + $0x30] sm:$0xff]  ;;  %v126_v13 = vld [vmem:[#allocation5 + $0x38] sm:$0xff]  ;;  %v127_v15 = vld [vmem:[#allocation5 + $0x40] sm:$0xff]  ;;  %s546_s7 = scalar_lea.vmem %s312_s6, 128  ;;  %p551_p3 = scmp.lt.s32.totalorder %s312_s6, %s312_s6 }
  0x2a   :  { %441 = vmatpush3.bf16.msra.mxu0 %v440_v4  ;;  %444 = vmatpush3.bf16.msra.mxu1 %v443_v8  ;;  %v449_v14 = vpack.c.bf16 %v126_v13, %v125_v12  ;;  %v128_v16 = vld [vmem:[#allocation5 + $0x48] sm:$0xff]  ;;  %v129_v18 = vld [vmem:[#allocation5 + $0x50] sm:$0xff]  ;;  %v130_v19 = vld [vmem:[#allocation5 + $0x58] sm:$0xff]  ;;  %p547_p2 = scmp.ne.s32.totalorder %s312_s6, %s546_s7  ;;  %p552_p4 = scmp.lt.s32.totalorder %s546_s7, %s546_s7 }
  0x2b   :  { %466 = vmatprep.subr.bf16.mxu0 %v578_v0  ;;  %445 = vmatprep.subr.bf16.mxu1 %v578_v0  ;;  %v452_v17 = vpack.c.bf16 %v128_v16, %v127_v15  ;;  %v455_v20 = vpack.c.bf16 %v130_v19, %v129_v18  ;;  %v131_v21 = vld [vmem:[#allocation5 + $0x60] sm:$0xff]  ;;  %v132_v22 = vld [vmem:[#allocation5 + $0x68] sm:$0xff]  ;;  %v133_v24 = vld [vmem:[#allocation5 + $0x70] sm:$0xff] }
  0x2c   :  { %v458_v23 = vpack.c.bf16 %v132_v22, %v131_v21  ;;  %v134_v25 = vld [vmem:[#allocation5 + $0x78] sm:$0xff]  ;;  %v135_v27 = vld [vmem:[#allocation5 + $0x80] sm:$0xff]  ;;  %v136_v28 = vld [vmem:[#allocation5 + $0x88] sm:$0xff]  ;;  %p553_p5 = por %p552_p4, %p551_p3 }
  0x2d   :  { %367 = vmatmul.mubr.msk.f32.vlgmr.msra.gmra.mrb[0].mxu0 %vm46_vm1, %v38_v10  ;;  %v461_v26 = vpack.c.bf16 %v134_v25, %v133_v24  ;;  %v464_v29 = vpack.c.bf16 %v136_v28, %v135_v27  ;;  %v213_v30 = vld [vmem:[#allocation5 + $0x90] sm:$0xff]  ;;  %v214_v31 = vld [vmem:[#allocation5 + $0x98] sm:$0xff]  ;;  %v215_v32 = vld [vmem:[#allocation5 + $0xa0] sm:$0xff] }
  0x2e   :  { %436 = vmatprep.mubr.msk.f32.mxu0 %vm579_vm0, %v580_v1  ;;  %447 = vmatpush3.bf16.msra.mxu1 %v446_v11  ;;  %v467_v33 = vpack.c.bf16 %v214_v31, %v213_v30  ;;  %v216_v34 = vld [vmem:[#allocation5 + $0xa8] sm:$0xff]  ;;  %v217_v36 = vld [vmem:[#allocation5 + $0xb0] sm:$0xff]  ;;  %v218_v37 = vld [vmem:[#allocation5 + $0xb8] sm:$0xff]  ;;  %p554_p6 = pnand %p553_p5, %p547_p2 }
  0x2f   :  { %448 = vmatprep.subr.bf16.mxu1 %v578_v0  ;;  %v470_v35 = vpack.c.bf16 %v216_v34, %v215_v32  ;;  %v473_v38 = vpack.c.bf16 %v218_v37, %v217_v36  ;;  %v219_v39 = vld [vmem:[#allocation5 + $0xc0] sm:$0xff]  ;;  %v220_v40 = vld [vmem:[#allocation5 + $0xc8] sm:$0xff]  ;;  %v221_v42 = vld [vmem:[#allocation5 + $0xd0] sm:$0xff] }
  0x30   :  { %468 = vmatpush3.bf16.msra.mxu0 %v467_v33  ;;  %v476_v41 = vpack.c.bf16 %v220_v40, %v219_v39  ;;  %v222_v43 = vld [vmem:[#allocation5 + $0xd8] sm:$0xff]  ;;  %v321_v45 = vld [vmem:[#allocation5 + $0x110] ss:$0 sm:$0xff]  ;;  %v223_v50 = vld [vmem:[#allocation5 + $0xe0] sm:$0xff] }
  0x31   :  { %469 = vmatprep.subr.bf16.mxu0 %v578_v0  ;;  %v479_v44 = vpack.c.bf16 %v222_v43, %v221_v42  ;;  %v224_v51 = vld [vmem:[#allocation5 + $0xe8] sm:$0xff]  ;;  %v225_v53 = vld [vmem:[#allocation5 + $0xf0] sm:$0xff]  ;;  %v226_v54 = vld [vmem:[#allocation5 + $0xf8] sm:$0xff] }
  0x32   :  { %450 = vmatpush3.bf16.msra.mxu1 %v449_v14  ;;  %v482_v52 = vpack.c.bf16 %v224_v51, %v223_v50  ;;  %v485_v55 = vpack.c.bf16 %v226_v54, %v225_v53  ;;  %v227_v56 = vld [vmem:[#allocation5 + $0x100] sm:$0xff]  ;;  %v228_v57 = vld [vmem:[#allocation5 + $0x108] sm:$0xff]  ;;  %v323_v59 = vld [vmem:[#allocation5 + $0x111] ss:$0 sm:$0xff] }
  0x33   :  { %451 = vmatprep.subr.bf16.mxu1 %v578_v0  ;;  %v488_v58 = vpack.c.bf16 %v228_v57, %v227_v56  ;;  %v324_v1 = vld [vmem:[#allocation5 + $0x112] ss:$0 sm:$0xff] }
  0x34   :  { %471 = vmatpush3.bf16.msra.mxu0 %v470_v35 }
  0x35   :  { %472 = vmatprep.subr.bf16.mxu0 %v578_v0 }
  0x36   :  { %453 = vmatpush3.bf16.msra.mxu1 %v452_v17 }
  0x37   :  { %454 = vmatprep.subr.bf16.mxu1 %v578_v0 }
  0x38   :  { %474 = vmatpush3.bf16.msra.mxu0 %v473_v38 }
  0x39   :  { %475 = vmatprep.subr.bf16.mxu0 %v578_v0 }
  0x3a   :  { %456 = vmatpush3.bf16.msra.mxu1 %v455_v20 }
  0x3b   :  { %457 = vmatprep.subr.bf16.mxu1 %v578_v0 }
  0x3c   :  { %477 = vmatpush3.bf16.msra.mxu0 %v476_v41 }
  0x3d   :  { %478 = vmatprep.subr.bf16.mxu0 %v578_v0 }
  0x3e   :  { %459 = vmatpush3.bf16.msra.mxu1 %v458_v23 }
  0x3f   :  { %460 = vmatprep.subr.bf16.mxu1 %v578_v0 }
  0x40   :  { %480 = vmatpush3.bf16.msra.mxu0 %v479_v44 }
  0x41   :  { %481 = vmatprep.subr.bf16.mxu0 %v578_v0 }
  0x42   :  { %462 = vmatpush3.bf16.msra.mxu1 %v461_v26 }
  0x43   :  { %463 = vmatprep.subr.bf16.mxu1 %v578_v0 }
  0x44   :  { %483 = vmatpush3.bf16.msra.mxu0 %v482_v52 }
  0x45   :  { %484 = vmatprep.subr.bf16.mxu0 %v578_v0 }
  0x46   :  { %465 = vmatpush3.bf16.msra.mxu1 %v464_v29 }
  0x48   :  { %486 = vmatpush3.bf16.msra.mxu0 %v485_v55 }
  0x49   :  { %487 = vmatprep.subr.bf16.mxu0 %v578_v0 }
  0x4c   :  { %489 = vmatpush3.bf16.msra.mxu0 %v488_v58 }
 0x100   :  { %v116_v46 = vpop.f32.mrb[0].mxu0 }
 0x101   :  { %v117_v47 = vadd.f32 %v321_v45, %v116_v46  ;;  %v368_v48 = vpop.f32.mrb[1].mxu0 }
 0x103   :  { %498 = vtanh.f32 %v117_v47 }
 0x10d   :  { %v499_v49 = vpop.eup %498 }
 0x10e   :  { %402 = vmatmul.mubr.f32.vlgmr.msra.gmra.mrb[0].mxu1 %v499_v49 }
 0x1e1   :  { %v208_v60 = vpop.f32.mrb[0].mxu1 }
 0x1e2   :  { %v209_v61 = vadd.f32 %v323_v59, %v208_v60  ;;  %v403_v62 = vpop.f32.mrb[1].mxu1 }
 0x1e4   :  { %500 = vtanh.f32 %v209_v61 }
 0x1ee   :  { %v501_v63 = vpop.eup %500 }
 0x1ef   :  { %437 = vmatmul.mubr.f32.vlgmr.msra.gmra.mrb[2].mxu0 %v501_v63 }
 0x2c2   :  { %v300_v2 = vpop.f32.mrb[2].mxu0 }
 0x2c3   :  { %v301_v3 = vadd.f32 %v324_v1, %v300_v2  ;;  %v438_v4 = vpop.f32.mrb[3].mxu0 }
 0x2c5   :  { %304 = vst [vmem:[#allocation7] sm:$0xff] %v301_v3 }
 0x2c6   :  { %557 = shalt.err (!%p554_p6)
}
 0x2c7   :  { %s558_s10 = scalar_lea.hbm %s662_s2, 128 }
 0x2c8   :  { %p559_p7 = scmp.ne.s32.totalorder %s662_s2, %s558_s10  ;;  %p562_p8 = scmp.lt.u32.totalorder %s558_s10, %s662_s2 }
 0x2ca   :  { %p564_p9 = pnand %p562_p8, %p559_p7 }
 0x2cc   :  { %567 = shalt.err (!%p564_p9)
}
 0x2cd   :  { %314 = dma.vmem_to_hbm [thread:$0]  %s312_s6, 128, %s662_s2, [#allocation4]  }
 0x2ce   :  { %572 = dma.done.wait [#allocation4], 128  }
 0x2cf   :  { %573 = vsyncadd [#allocation4], 4294967168 }
 0x2d0   :  { %318 = vsyncpa [#allocation3], 1 }
 0x2d1   :  { %319 = vsyncpa [#allocation6], 1 }
 0x2d2   :  { %320 = vsyncpa [#allocation4], 1 }

</bundles_post_ra>
